<compile_context>
chip_gen: v6e
topology: v6e:2x2x1
jax: 0.10.0
libtpu: 0.0.40
codegen_flags: <defaults>
</compile_context>

<pallas_src>
import numpy as np
import jax
import jax.numpy as jnp
from jax import lax
from jax.experimental import pallas as pl
from jax.experimental.pallas import tpu as pltpu


def _round_up(x, m):
    return (x + m - 1) // m * m


def _round_down(x, m):
    return x // m * m


def _cdiv(a, b):
    return (a + b - 1) // b


def batch_timeseries_interpolate(times, values, t, *, batch_block=None, time_block=None):
    """times, values: (ntime, nbatch); t: (nbatch,) -> (nbatch,)"""
    ntime, nbatch = times.shape
    assert values.shape == (ntime, nbatch)
    assert t.shape == (nbatch,)
    assert ntime >= 2, "need at least two time points"
    out_dtype = values.dtype
    itemsize = int(times.dtype.itemsize)

    # ---------------- generation-aware VMEM budget ----------------
    try:
        vmem_cap = int(pltpu.get_tpu_info().vmem_capacity_bytes)  # 128 MiB v5e/v6e, 64 MiB v7x
    except Exception:
        vmem_cap = 64 << 20                   # conservative fallback (v7x physical)
    vmem_budget = vmem_cap // 2               # target total footprint (tiles + temps + scratch)
    vmem_limit = (vmem_cap * 3) // 4          # scoped limit handed to Mosaic (headroom on top)

    # Per-lane VMEM bytes for a (TT, BB) time tile:
    #   2 inputs x 2 pipeline buffers x TT x itemsize   (times/values tiles)
    # + ~4 x TT x 4                                     (in-kernel (TT,BB) temps: le/iota/masks/selects)
    # + 2 x 2 x 8 x itemsize                            (t and out (1,BB) blocks, sublane-padded to 8)
    # + 5 x 8 x 4                                       (scratch rows, sublane-padded to 8)
    per_row = 4 * itemsize + 16
    fixed = 32 * itemsize + 160

    def lane_bytes(tt):
        return per_row * tt + fixed

    # ---------------- time-axis block TT ----------------
    if time_block is not None:
        TT = min(int(time_block), ntime)
        if TT < ntime:
            assert TT % 8 == 0, "time_block must be a multiple of 8 when tiling the time axis"
        num_t_blocks = _cdiv(ntime, TT)
    elif lane_bytes(ntime) * 128 <= vmem_budget:
        TT = ntime                            # whole time axis resident (common case)
        num_t_blocks = 1
    else:
        # Large ntime: tile the time axis.  Pick the largest multiple-of-8 TT such that
        # a BB=128 tile (plus temporaries/scratch) fits, then balance blocks to minimize padding.
        tt_max = max(8, _round_down((vmem_budget // 128 - fixed) // per_row, 8))
        num_t_blocks = _cdiv(ntime, tt_max)
        TT = _round_up(_cdiv(ntime, num_t_blocks), 8)
    tp_total = TT * num_t_blocks              # padded time extent

    # ---------------- batch-axis block BB: grow to fill the budget ----------------
    nb_pad = _round_up(nbatch, 128)
    if batch_block is not None:
        BB = int(batch_block)
        assert BB % 128 == 0
    else:
        BB = max(128, _round_down(vmem_budget // lane_bytes(TT), 128))
        # keep >= 2 batch blocks whenever possible so v7x's two TensorCores both get work
        if nb_pad >= 256:
            BB = min(BB, max(128, _round_down(nb_pad // 2, 128)))
        BB = min(BB, nb_pad)
    nb_total = _round_up(nb_pad, BB)
    num_b_blocks = nb_total // BB

    # ---------------- pad inputs ----------------
    bpad = nb_total - nbatch
    if bpad:
        # 'edge' padding keeps padded lanes well conditioned; they are sliced off afterwards.
        times_p = jnp.pad(times, ((0, 0), (0, bpad)), mode="edge")
        values_p = jnp.pad(values, ((0, 0), (0, bpad)), mode="edge")
        t_p = jnp.pad(t, (0, bpad), mode="edge")
    else:
        times_p, values_p, t_p = times, values, t

    tpad = tp_total - ntime
    if tpad:
        # Extend the series along the last segment's straight line: padded rows keep times
        # strictly increasing and reproduce torch's slopes[-1] extrapolation exactly, so no
        # validity masking is needed inside the kernel.
        steps = jnp.arange(1, tpad + 1, dtype=times_p.dtype).reshape(tpad, 1)
        dt_last = times_p[-1:] - times_p[-2:-1]
        dv_last = values_p[-1:] - values_p[-2:-1]
        times_p = jnp.concatenate([times_p, times_p[-1:] + steps * dt_last], axis=0)
        values_p = jnp.concatenate([values_p, values_p[-1:] + steps * dv_last], axis=0)

    t2 = t_p.reshape(1, nb_total)

    # ---------------- kernel ----------------
    def kernel(times_ref, values_ref, t_ref, out_ref,
               cnt_ref, lov_ref, lot_ref, hiv_ref, hit_ref):
        k = pl.program_id(1)

        @pl.when(k == 0)
        def _init():
            cnt_ref[...] = jnp.zeros_like(cnt_ref)
            lov_ref[...] = jnp.zeros_like(lov_ref)
            lot_ref[...] = jnp.zeros_like(lot_ref)
            hiv_ref[...] = jnp.zeros_like(hiv_ref)
            hit_ref[...] = jnp.zeros_like(hit_ref)

        tms = times_ref[...].astype(jnp.float32)      # (TT, BB)
        vls = values_ref[...].astype(jnp.float32)     # (TT, BB)
        tq = t_ref[...].astype(jnp.float32)           # (1, BB)

        # times increase along axis 0, so `le` is a prefix-of-True mask within the block.
        le = tms <= tq                                                        # (TT, BB)
        local_cnt = jnp.sum(le.astype(jnp.int32), axis=0, keepdims=True)      # (1, BB)

        # Gather the two bracketing endpoints of this block with one shared iota.
        # No (T-1,BB) slopes array, no per-element divide.
        row = lax.broadcasted_iota(jnp.int32, (TT, BB), 0)
        mask_lo = row == (local_cnt - 1)      # last row with time <= t (if any in this block)
        mask_hi = row == local_cnt            # first row with time  > t (if any in this block)
        blk_lo_v = jnp.sum(jnp.where(mask_lo, vls, 0.0), axis=0, keepdims=True)
        blk_lo_t = jnp.sum(jnp.where(mask_lo, tms, 0.0), axis=0, keepdims=True)
        blk_hi_v = jnp.sum(jnp.where(mask_hi, vls, 0.0), axis=0, keepdims=True)
        blk_hi_t = jnp.sum(jnp.where(mask_hi, tms, 0.0), axis=0, keepdims=True)

        cnt_before = cnt_ref[...]
        # lo: the last block containing any True row wins.
        upd_lo = local_cnt > 0
        # hi: only the block containing the globally-first False row writes it.
        upd_hi = jnp.logical_and(cnt_before == k * TT, local_cnt < TT)

        lov_ref[...] = jnp.where(upd_lo, blk_lo_v, lov_ref[...])
        lot_ref[...] = jnp.where(upd_lo, blk_lo_t, lot_ref[...])
        hiv_ref[...] = jnp.where(upd_hi, blk_hi_v, hiv_ref[...])
        hit_ref[...] = jnp.where(upd_hi, blk_hi_t, hit_ref[...])
        cnt_ref[...] = cnt_before + local_cnt

        @pl.when(k == num_t_blocks - 1)
        def _finalize():
            cnt_tot = cnt_ref[...]
            # count == 0 or count == T  ->  torch's gi-1 == -1: last point + last segment's
            # slope (rows T-2, T-1 live in this, the last, block).
            wrap = jnp.logical_or(cnt_tot == 0, cnt_tot == tp_total)
            last_v, last_t = vls[TT - 1:TT, :], tms[TT - 1:TT, :]
            prev_v, prev_t = vls[TT - 2:TT - 1, :], tms[TT - 2:TT - 1, :]
            sel_v = jnp.where(wrap, last_v, lov_ref[...])
            sel_t = jnp.where(wrap, last_t, lot_ref[...])
            dv = jnp.where(wrap, last_v - prev_v, hiv_ref[...] - lov_ref[...])
            dt = jnp.where(wrap, last_t - prev_t, hit_ref[...] - lot_ref[...])
            out_ref[...] = (sel_v + (dv / dt) * (tq - sel_t)).astype(out_ref.dtype)

    cost = pl.CostEstimate(
        flops=10 * tp_total * nb_total,
        transcendentals=0,
        bytes_accessed=(2 * tp_total + 2) * nb_total * itemsize,
    )

    out = pl.pallas_call(
        kernel,
        out_shape=jax.ShapeDtypeStruct((1, nb_total), out_dtype),
        grid_spec=pltpu.PrefetchScalarGridSpec(
            num_scalar_prefetch=0,
            grid=(num_b_blocks, num_t_blocks),
            in_specs=[
                pl.BlockSpec((TT, BB), lambda b, k: (k, b)),
                pl.BlockSpec((TT, BB), lambda b, k: (k, b)),
                pl.BlockSpec((1, BB), lambda b, k: (0, b)),
            ],
            out_specs=pl.BlockSpec((1, BB), lambda b, k: (0, b)),
            scratch_shapes=[
                pltpu.VMEM((1, BB), jnp.int32),     # running count of times <= t
                pltpu.VMEM((1, BB), jnp.float32),   # value at last  time <= t
                pltpu.VMEM((1, BB), jnp.float32),   # time  at last  time <= t
                pltpu.VMEM((1, BB), jnp.float32),   # value at first time  > t
                pltpu.VMEM((1, BB), jnp.float32),   # time  at first time  > t
            ],
        ),
        compiler_params=pltpu.CompilerParams(
            dimension_semantics=("parallel", "arbitrary"),
            vmem_limit_bytes=vmem_limit,
        ),
        cost_estimate=cost,
    )(times_p, values_p, t2)
    return out[0, :nbatch]


def _reference_numpy(times, values, t):
    """Direct transcription of the PyTorch forward (numpy keeps negative-index wrap)."""
    times = np.asarray(times)
    values = np.asarray(values)
    t = np.asarray(t)
    ntime, nbatch = times.shape
    slopes = np.diff(values, axis=0) / np.diff(times, axis=0)
    count = np.sum(times - t[None, :] <= 0, axis=0)
    gi = count % ntime
    idx = gi - 1
    out = np.empty(nbatch, dtype=values.dtype)
    for b in range(nbatch):
        out[b] = values[idx[b], b] + slopes[idx[b], b] * (t[b] - times[idx[b], b])
    return out


if __name__ == "__main__":
    # --- test 1: small shape, single time block / single batch block ---
    ntime, nbatch = 8, 16
    k1, k2, k3 = jax.random.split(jax.random.PRNGKey(0), 3)
    dt = jax.random.uniform(k1, (ntime, nbatch), jnp.float32, 0.1, 1.0)
    times = jnp.cumsum(dt, axis=0)                      # strictly increasing per column
    values = jax.random.normal(k2, (ntime, nbatch), jnp.float32)
    frac = jax.random.uniform(k3, (nbatch,), jnp.float32, -0.05, 1.05)
    t = times[0] + frac * (times[-1] - times[0])

    out = jax.block_until_ready(batch_timeseries_interpolate(times, values, t))
    np.testing.assert_allclose(np.asarray(out), _reference_numpy(times, values, t),
                               rtol=1e-4, atol=1e-4)

    # --- test 2: exercises time-axis tiling + padding, multiple batch blocks, wrap cases ---
    ntime2, nbatch2 = 20, 300
    k4, k5, k6 = jax.random.split(jax.random.PRNGKey(0), 3)
    dt2 = jax.random.uniform(k4, (ntime2, nbatch2), jnp.float32, 0.1, 1.0)
    times2 = jnp.cumsum(dt2, axis=0)
    values2 = jax.random.normal(k5, (ntime2, nbatch2), jnp.float32)
    frac2 = jax.random.uniform(k6, (nbatch2,), jnp.float32, -0.05, 1.05)
    tq2 = times2[0] + frac2 * (times2[-1] - times2[0])
    tq2 = tq2.at[0].set(times2[0, 0] - 1.0)     # below the whole range  -> wrap branch
    tq2 = tq2.at[1].set(times2[-1, 1] + 10.0)   # far above the range    -> wrap branch
    tq2 = tq2.at[2].set(times2[-1, 2] + 0.01)   # just above the range   -> extrapolation

    out2 = jax.block_until_ready(
        batch_timeseries_interpolate(times2, values2, tq2, batch_block=128, time_block=8))
    np.testing.assert_allclose(np.asarray(out2), _reference_numpy(times2, values2, tq2),
                               rtol=1e-4, atol=1e-4)

    print("KERNEL_OK")
</pallas_src>

<mosaic_0001>
module attributes {stable_mosaic.version = 11 : i64} {
  func.func @kernel(%arg0: i32, %arg1: i32, %arg2: memref<8x128xf32, #tpu.memory_space<vmem>>, %arg3: memref<8x128xf32, #tpu.memory_space<vmem>>, %arg4: memref<1x128xf32, #tpu.memory_space<vmem>>, %arg5: memref<1x128xf32, #tpu.memory_space<vmem>>, %arg6: memref<1x128xi32, #tpu.memory_space<vmem>>, %arg7: memref<1x128xf32, #tpu.memory_space<vmem>>, %arg8: memref<1x128xf32, #tpu.memory_space<vmem>>, %arg9: memref<1x128xf32, #tpu.memory_space<vmem>>, %arg10: memref<1x128xf32, #tpu.memory_space<vmem>>) attributes {dimension_semantics = [#tpu.dimension_semantics<parallel>, #tpu.dimension_semantics<arbitrary>], iteration_bounds = array<i64: 1, 1>, scalar_prefetch = 0 : i64, scratch_operands = 5 : i64, tpu.core_type = #tpu.core_type<tc>, window_params = [{transform_indices = @transform_0, window_bounds = array<i64: 8, 128>}, {transform_indices = @transform_1, window_bounds = array<i64: 8, 128>}, {transform_indices = @transform_2, window_bounds = array<i64: 1, 128>}, {transform_indices = @transform_3, window_bounds = array<i64: 1, 128>}]} {
    %c0_i32 = arith.constant 0 : i32
    %0 = arith.cmpi eq, %arg1, %c0_i32 : i32
    %1 = arith.extui %0 : i1 to i32
    %c0_i32_0 = arith.constant 0 : i32
    %2 = arith.cmpi ne, %1, %c0_i32_0 : i32
    scf.if %2 {
      %c0_i32_38 = arith.constant 0 : i32
      %60 = vector.broadcast %c0_i32_38 : i32 to vector<1x128xi32>
      %c0_39 = arith.constant 0 : index
      %c0_40 = arith.constant 0 : index
      %61 = vector.load %arg6[%c0_39, %c0_40] : memref<1x128xi32, #tpu.memory_space<vmem>>, vector<1x128xi32>
      tpu.vector_store %arg6[%c0_39, %c0_40], %60 {strides = array<i32>} : memref<1x128xi32, #tpu.memory_space<vmem>>, vector<1x128xi32>,
      %cst_41 = arith.constant 0.000000e+00 : f32
      %62 = vector.broadcast %cst_41 : f32 to vector<1x128xf32>
      %c0_42 = arith.constant 0 : index
      %c0_43 = arith.constant 0 : index
      %63 = vector.load %arg7[%c0_42, %c0_43] : memref<1x128xf32, #tpu.memory_space<vmem>>, vector<1x128xf32>
      tpu.vector_store %arg7[%c0_42, %c0_43], %62 {strides = array<i32>} : memref<1x128xf32, #tpu.memory_space<vmem>>, vector<1x128xf32>,
      %cst_44 = arith.constant 0.000000e+00 : f32
      %64 = vector.broadcast %cst_44 : f32 to vector<1x128xf32>
      %c0_45 = arith.constant 0 : index
      %c0_46 = arith.constant 0 : index
      %65 = vector.load %arg8[%c0_45, %c0_46] : memref<1x128xf32, #tpu.memory_space<vmem>>, vector<1x128xf32>
      tpu.vector_store %arg8[%c0_45, %c0_46], %64 {strides = array<i32>} : memref<1x128xf32, #tpu.memory_space<vmem>>, vector<1x128xf32>,
      %cst_47 = arith.constant 0.000000e+00 : f32
      %66 = vector.broadcast %cst_47 : f32 to vector<1x128xf32>
      %c0_48 = arith.constant 0 : index
      %c0_49 = arith.constant 0 : index
      %67 = vector.load %arg9[%c0_48, %c0_49] : memref<1x128xf32, #tpu.memory_space<vmem>>, vector<1x128xf32>
      tpu.vector_store %arg9[%c0_48, %c0_49], %66 {strides = array<i32>} : memref<1x128xf32, #tpu.memory_space<vmem>>, vector<1x128xf32>,
      %cst_50 = arith.constant 0.000000e+00 : f32
      %68 = vector.broadcast %cst_50 : f32 to vector<1x128xf32>
      %c0_51 = arith.constant 0 : index
      %c0_52 = arith.constant 0 : index
      %69 = vector.load %arg10[%c0_51, %c0_52] : memref<1x128xf32, #tpu.memory_space<vmem>>, vector<1x128xf32>
      tpu.vector_store %arg10[%c0_51, %c0_52], %68 {strides = array<i32>} : memref<1x128xf32, #tpu.memory_space<vmem>>, vector<1x128xf32>,
    } else {
    }
    %c0 = arith.constant 0 : index
    %c0_1 = arith.constant 0 : index
    %3 = vector.load %arg2[%c0, %c0_1] : memref<8x128xf32, #tpu.memory_space<vmem>>, vector<8x128xf32>
    %c0_2 = arith.constant 0 : index
    %c0_3 = arith.constant 0 : index
    %4 = vector.load %arg3[%c0_2, %c0_3] : memref<8x128xf32, #tpu.memory_space<vmem>>, vector<8x128xf32>
    %c0_4 = arith.constant 0 : index
    %c0_5 = arith.constant 0 : index
    %5 = vector.load %arg4[%c0_4, %c0_5] : memref<1x128xf32, #tpu.memory_space<vmem>>, vector<1x128xf32>
    %6 = vector.broadcast %5 : vector<1x128xf32> to vector<8x128xf32>
    %7 = arith.cmpf ole, %3, %6 : vector<8x128xf32>
    %8 = arith.extui %7 : vector<8x128xi1> to vector<8x128xi32>
    %cst = arith.constant dense<0> : vector<128xi32>
    %9 = vector.multi_reduction <add>, %8, %cst [0] : vector<8x128xi32> to vector<128xi32>
    %10 = vector.shape_cast %9 : vector<128xi32> to vector<1x128xi32>
    %11 = tpu.iota {dimensions = array<i32: 0>} : vector<8x128xi32>
    %c1_i32 = arith.constant 1 : i32
    %12 = vector.broadcast %c1_i32 : i32 to vector<1x128xi32>
    %13 = arith.subi %10, %12 : vector<1x128xi32>
    %14 = vector.broadcast %13 : vector<1x128xi32> to vector<8x128xi32>
    %15 = arith.cmpi eq, %11, %14 : vector<8x128xi32>
    %16 = vector.broadcast %10 : vector<1x128xi32> to vector<8x128xi32>
    %17 = arith.cmpi eq, %11, %16 : vector<8x128xi32>
    %cst_6 = arith.constant 0.000000e+00 : f32
    %18 = vector.broadcast %cst_6 : f32 to vector<8x128xf32>
    %19 = arith.select %15, %4, %18 : vector<8x128xi1>, vector<8x128xf32>
    %cst_7 = arith.constant dense<0.000000e+00> : vector<128xf32>
    %20 = vector.multi_reduction <add>, %19, %cst_7 [0] : vector<8x128xf32> to vector<128xf32>
    %21 = vector.shape_cast %20 : vector<128xf32> to vector<1x128xf32>
    %cst_8 = arith.constant 0.000000e+00 : f32
    %22 = vector.broadcast %cst_8 : f32 to vector<8x128xf32>
    %23 = arith.select %15, %3, %22 : vector<8x128xi1>, vector<8x128xf32>
    %cst_9 = arith.constant dense<0.000000e+00> : vector<128xf32>
    %24 = vector.multi_reduction <add>, %23, %cst_9 [0] : vector<8x128xf32> to vector<128xf32>
    %25 = vector.shape_cast %24 : vector<128xf32> to vector<1x128xf32>
    %cst_10 = arith.constant 0.000000e+00 : f32
    %26 = vector.broadcast %cst_10 : f32 to vector<8x128xf32>
    %27 = arith.select %17, %4, %26 : vector<8x128xi1>, vector<8x128xf32>
    %cst_11 = arith.constant dense<0.000000e+00> : vector<128xf32>
    %28 = vector.multi_reduction <add>, %27, %cst_11 [0] : vector<8x128xf32> to vector<128xf32>
    %29 = vector.shape_cast %28 : vector<128xf32> to vector<1x128xf32>
    %cst_12 = arith.constant 0.000000e+00 : f32
    %30 = vector.broadcast %cst_12 : f32 to vector<8x128xf32>
    %31 = arith.select %17, %3, %30 : vector<8x128xi1>, vector<8x128xf32>
    %cst_13 = arith.constant dense<0.000000e+00> : vector<128xf32>
    %32 = vector.multi_reduction <add>, %31, %cst_13 [0] : vector<8x128xf32> to vector<128xf32>
    %33 = vector.shape_cast %32 : vector<128xf32> to vector<1x128xf32>
    %c0_14 = arith.constant 0 : index
    %c0_15 = arith.constant 0 : index
    %34 = vector.load %arg6[%c0_14, %c0_15] : memref<1x128xi32, #tpu.memory_space<vmem>>, vector<1x128xi32>
    %c0_i32_16 = arith.constant 0 : i32
    %35 = vector.broadcast %c0_i32_16 : i32 to vector<1x128xi32>
    %36 = arith.cmpi sgt, %10, %35 : vector<1x128xi32>
    %c8_i32 = arith.constant 8 : i32
    %37 = arith.muli %arg1, %c8_i32 : i32
    %38 = vector.broadcast %37 : i32 to vector<1x128xi32>
    %39 = arith.cmpi eq, %34, %38 : vector<1x128xi32>
    %c8_i32_17 = arith.constant 8 : i32
    %40 = vector.broadcast %c8_i32_17 : i32 to vector<1x128xi32>
    %41 = arith.cmpi slt, %10, %40 : vector<1x128xi32>
    %42 = arith.andi %39, %41 : vector<1x128xi1>
    %c0_18 = arith.constant 0 : index
    %c0_19 = arith.constant 0 : index
    %43 = vector.load %arg7[%c0_18, %c0_19] : memref<1x128xf32, #tpu.memory_space<vmem>>, vector<1x128xf32>
    %44 = arith.select %36, %21, %43 : vector<1x128xi1>, vector<1x128xf32>
    %c0_20 = arith.constant 0 : index
    %c0_21 = arith.constant 0 : index
    %45 = vector.load %arg7[%c0_20, %c0_21] : memref<1x128xf32, #tpu.memory_space<vmem>>, vector<1x128xf32>
    tpu.vector_store %arg7[%c0_20, %c0_21], %44 {strides = array<i32>} : memref<1x128xf32, #tpu.memory_space<vmem>>, vector<1x128xf32>,
    %c0_22 = arith.constant 0 : index
    %c0_23 = arith.constant 0 : index
    %46 = vector.load %arg8[%c0_22, %c0_23] : memref<1x128xf32, #tpu.memory_space<vmem>>, vector<1x128xf32>
    %47 = arith.select %36, %25, %46 : vector<1x128xi1>, vector<1x128xf32>
    %c0_24 = arith.constant 0 : index
    %c0_25 = arith.constant 0 : index
    %48 = vector.load %arg8[%c0_24, %c0_25] : memref<1x128xf32, #tpu.memory_space<vmem>>, vector<1x128xf32>
    tpu.vector_store %arg8[%c0_24, %c0_25], %47 {strides = array<i32>} : memref<1x128xf32, #tpu.memory_space<vmem>>, vector<1x128xf32>,
    %c0_26 = arith.constant 0 : index
    %c0_27 = arith.constant 0 : index
    %49 = vector.load %arg9[%c0_26, %c0_27] : memref<1x128xf32, #tpu.memory_space<vmem>>, vector<1x128xf32>
    %50 = arith.select %42, %29, %49 : vector<1x128xi1>, vector<1x128xf32>
    %c0_28 = arith.constant 0 : index
    %c0_29 = arith.constant 0 : index
    %51 = vector.load %arg9[%c0_28, %c0_29] : memref<1x128xf32, #tpu.memory_space<vmem>>, vector<1x128xf32>
    tpu.vector_store %arg9[%c0_28, %c0_29], %50 {strides = array<i32>} : memref<1x128xf32, #tpu.memory_space<vmem>>, vector<1x128xf32>,
    %c0_30 = arith.constant 0 : index
    %c0_31 = arith.constant 0 : index
    %52 = vector.load %arg10[%c0_30, %c0_31] : memref<1x128xf32, #tpu.memory_space<vmem>>, vector<1x128xf32>
    %53 = arith.select %42, %33, %52 : vector<1x128xi1>, vector<1x128xf32>
    %c0_32 = arith.constant 0 : index
    %c0_33 = arith.constant 0 : index
    %54 = vector.load %arg10[%c0_32, %c0_33] : memref<1x128xf32, #tpu.memory_space<vmem>>, vector<1x128xf32>
    tpu.vector_store %arg10[%c0_32, %c0_33], %53 {strides = array<i32>} : memref<1x128xf32, #tpu.memory_space<vmem>>, vector<1x128xf32>,
    %55 = arith.addi %34, %10 : vector<1x128xi32>
    %c0_34 = arith.constant 0 : index
    %c0_35 = arith.constant 0 : index
    %56 = vector.load %arg6[%c0_34, %c0_35] : memref<1x128xi32, #tpu.memory_space<vmem>>, vector<1x128xi32>
    tpu.vector_store %arg6[%c0_34, %c0_35], %55 {strides = array<i32>} : memref<1x128xi32, #tpu.memory_space<vmem>>, vector<1x128xi32>,
    %c0_i32_36 = arith.constant 0 : i32
    %57 = arith.cmpi eq, %arg1, %c0_i32_36 : i32
    %58 = arith.extui %57 : i1 to i32
    %c0_i32_37 = arith.constant 0 : i32
    %59 = arith.cmpi ne, %58, %c0_i32_37 : i32
    scf.if %59 {
      %c0_38 = arith.constant 0 : index
      %c0_39 = arith.constant 0 : index
      %60 = vector.load %arg6[%c0_38, %c0_39] : memref<1x128xi32, #tpu.memory_space<vmem>>, vector<1x128xi32>
      %c0_i32_40 = arith.constant 0 : i32
      %61 = vector.broadcast %c0_i32_40 : i32 to vector<1x128xi32>
      %62 = arith.cmpi eq, %60, %61 : vector<1x128xi32>
      %c8_i32_41 = arith.constant 8 : i32
      %63 = vector.broadcast %c8_i32_41 : i32 to vector<1x128xi32>
      %64 = arith.cmpi eq, %60, %63 : vector<1x128xi32>
      %65 = arith.ori %62, %64 : vector<1x128xi1>
      %66 = vector.extract_strided_slice %4 {offsets = [7, 0], sizes = [1, 128], strides = [1, 1]} : vector<8x128xf32> to vector<1x128xf32>
      %67 = vector.extract_strided_slice %3 {offsets = [7, 0], sizes = [1, 128], strides = [1, 1]} : vector<8x128xf32> to vector<1x128xf32>
      %68 = vector.extract_strided_slice %4 {offsets = [6, 0], sizes = [1, 128], strides = [1, 1]} : vector<8x128xf32> to vector<1x128xf32>
      %69 = vector.extract_strided_slice %3 {offsets = [6, 0], sizes = [1, 128], strides = [1, 1]} : vector<8x128xf32> to vector<1x128xf32>
      %c0_42 = arith.constant 0 : index
      %c0_43 = arith.constant 0 : index
      %70 = vector.load %arg7[%c0_42, %c0_43] : memref<1x128xf32, #tpu.memory_space<vmem>>, vector<1x128xf32>
      %71 = arith.select %65, %66, %70 : vector<1x128xi1>, vector<1x128xf32>
      %c0_44 = arith.constant 0 : index
      %c0_45 = arith.constant 0 : index
      %72 = vector.load %arg8[%c0_44, %c0_45] : memref<1x128xf32, #tpu.memory_space<vmem>>, vector<1x128xf32>
      %73 = arith.select %65, %67, %72 : vector<1x128xi1>, vector<1x128xf32>
      %74 = arith.subf %66, %68 : vector<1x128xf32>
      %c0_46 = arith.constant 0 : index
      %c0_47 = arith.constant 0 : index
      %75 = vector.load %arg9[%c0_46, %c0_47] : memref<1x128xf32, #tpu.memory_space<vmem>>, vector<1x128xf32>
      %c0_48 = arith.constant 0 : index
      %c0_49 = arith.constant 0 : index
      %76 = vector.load %arg7[%c0_48, %c0_49] : memref<1x128xf32, #tpu.memory_space<vmem>>, vector<1x128xf32>
      %77 = arith.subf %75, %76 : vector<1x128xf32>
      %78 = arith.select %65, %74, %77 : vector<1x128xi1>, vector<1x128xf32>
      %79 = arith.subf %67, %69 : vector<1x128xf32>
      %c0_50 = arith.constant 0 : index
      %c0_51 = arith.constant 0 : index
      %80 = vector.load %arg10[%c0_50, %c0_51] : memref<1x128xf32, #tpu.memory_space<vmem>>, vector<1x128xf32>
      %c0_52 = arith.constant 0 : index
      %c0_53 = arith.constant 0 : index
      %81 = vector.load %arg8[%c0_52, %c0_53] : memref<1x128xf32, #tpu.memory_space<vmem>>, vector<1x128xf32>
      %82 = arith.subf %80, %81 : vector<1x128xf32>
      %83 = arith.select %65, %79, %82 : vector<1x128xi1>, vector<1x128xf32>
      %84 = arith.divf %78, %83 : vector<1x128xf32>
      %85 = arith.subf %5, %73 : vector<1x128xf32>
      %86 = arith.mulf %84, %85 : vector<1x128xf32>
      %87 = arith.addf %71, %86 : vector<1x128xf32>
      %c0_54 = arith.constant 0 : index
      %c0_55 = arith.constant 0 : index
      %88 = vector.load %arg5[%c0_54, %c0_55] : memref<1x128xf32, #tpu.memory_space<vmem>>, vector<1x128xf32>
      tpu.vector_store %arg5[%c0_54, %c0_55], %87 {strides = array<i32>} : memref<1x128xf32, #tpu.memory_space<vmem>>, vector<1x128xf32>,
    } else {
    }
    return
  }
  func.func @transform_0(%arg0: i32, %arg1: i32) -> (i32, i32) {
    %c0_i32 = arith.constant 0 : i32
    return %arg1, %arg0 : i32, i32
  }
  func.func @transform_1(%arg0: i32, %arg1: i32) -> (i32, i32) {
    %c0_i32 = arith.constant 0 : i32
    return %arg1, %arg0 : i32, i32
  }
  func.func @transform_2(%arg0: i32, %arg1: i32) -> (i32, i32) {
    %c0_i32 = arith.constant 0 : i32
    %c0_i32_0 = arith.constant 0 : i32
    return %c0_i32, %arg0 : i32, i32
  }
  func.func @transform_3(%arg0: i32, %arg1: i32) -> (i32, i32) {
    %c0_i32 = arith.constant 0 : i32
    %c0_i32_0 = arith.constant 0 : i32
    return %c0_i32, %arg0 : i32, i32
  }
}

</mosaic_0001>

<bundles_post_ra>
// kernel: tpu_custom_call.1
= control target key start
LH: loop header
LB: loop body
LE: loop exit
PB: predicated region body
PF: predicated region fallthrough
CT: control target
= control target key end

     0   :  { %8 = vsyncpa [#allocation8], 0  ;;  %s396_s0 = inlined_call_operand.hbm [shape: f32[8,128], index: 0, kind: input, shape index: {}]   ;;  %s397_s1 = inlined_call_operand.hbm [shape: f32[8,128], index: 1, kind: input, shape index: {}]   ;;  %s398_s2 = inlined_call_operand.vmem [shape: f32[1,128], index: 2, kind: input, shape index: {}]   ;;  %s399_s3 = inlined_call_operand.hbm [shape: f32[1,128], index: 3, kind: output, shape index: {}]  }
   0x1   :  { %9 = vsyncpa [#allocation11], 0 }
   0x2   :  { %10 = vsyncpa [#allocation9], 0  ;;  %s317_s12 = smov [#allocation7]   ;;  %s318_s14 = smov [#allocation10]  }
   0x3   :  { %s17_s13 = sshll.u32 %s317_s12, 4  ;;  %s27_s15 = sshll.u32 %s318_s14, 4  ;;  %s18_s13 = int_to_ptr.vmem [resolvable:$true] %s17_s13  ;;  %s28_s15 = int_to_ptr.vmem [resolvable:$true] %s27_s15 }
   0x4   :  { %s259_s16 = scalar_lea.vmem %s18_s13, 128  ;;  %p264_p1 = scmp.lt.s32.totalorder %s18_s13, %s18_s13 }
   0x5   :  { %p260_p0 = scmp.ne.s32.totalorder %s18_s13, %s259_s16  ;;  %p265_p2 = scmp.lt.s32.totalorder %s259_s16, %s259_s16 }
   0x7   :  { %p266_p3 = por %p265_p2, %p264_p1 }
   0x9   :  { %p267_p4 = pnand %p266_p3, %p260_p0 }
   0xb   :  { %270 = shalt.err (!%p267_p4)
}
   0xc   :  { %20 = dma.hbm_to_vmem [thread:$0]  %s396_s0, 128, %s18_s13, [#allocation8]  }
   0xd   :  { %s279_s19 = scalar_lea.vmem %s28_s15, 128  ;;  %p284_p6 = scmp.lt.s32.totalorder %s28_s15, %s28_s15 }
   0xe   :  { %p280_p5 = scmp.ne.s32.totalorder %s28_s15, %s279_s19  ;;  %p285_p7 = scmp.lt.s32.totalorder %s279_s19, %s279_s19 }
  0x10   :  { %p286_p8 = por %p285_p7, %p284_p6 }
  0x12   :  { %p287_p9 = pnand %p286_p8, %p280_p5 }
  0x14   :  { %290 = shalt.err (!%p287_p9)
}
  0x15   :  { %30 = dma.hbm_to_vmem [thread:$0]  %s397_s1, 128, %s28_s15, [#allocation11]  }
  0x16   :  { %311 = dma.done.wait [#allocation8], 128  }
  0x17   :  { %312 = vsyncadd [#allocation8], 4294967168 }
  0x18   :  { %313 = dma.done.wait [#allocation11], 128  }
  0x19   :  { %314 = vsyncadd [#allocation11], 4294967168  ;;  %v52_v0 = vlaneseq  ;;  %v319_v1 = vmov 0   ;;  %v320_v2 = vmov 0.0   ;;  %v349_v5 = vld [vmem:[#allocation7] sm:$0xff]  ;;  %v358_v16 = vld [vmem:[#allocation10] sm:$0xff] }
  0x1a   :  { %43 = vst [vmem:[#allocation2] sm:$0x1] %v319_v1  ;;  %44 = vst [vmem:[#allocation3] sm:$0x1] %v320_v2  ;;  %v354_v6 = vld [vmem:[%s398_s2] sm:$0x1] }
  0x1b   :  { %45 = vst [vmem:[#allocation4] sm:$0x1] %v320_v2  ;;  %46 = vst [vmem:[#allocation5] sm:$0x1] %v320_v2  ;;  %v53_v3 = vshrl.u32 %v52_v0, 7  ;;  %v193_v17 = vrot.slane %v349_v5, 7 }
  0x1c   :  { %47 = vst [vmem:[#allocation6] sm:$0x1] %v320_v2  ;;  %v321_v20 = vmov 1966171168   ;;  %v168_v58 = vrot.slane %v358_v16, 7  ;;  %s322_s1 = smov [#allocation12]  }
  0x1d   :  { %v54_v4 = vsub.s32 0, %v53_v3  ;;  %v130_v21 = vunpack.c.l.s4 %v321_v20  ;;  %v195_v28 = vsub.f32 %v349_v5, %v193_v17  ;;  %s230_s2 = sshll.u32 %s322_s1, 4  ;;  %s231_s2 = int_to_ptr.vmem [resolvable:$true] %s230_s2 }
  0x1e   :  { %v170_v2 = vsub.f32 %v358_v16, %v168_v58  ;;  %s291_s23 = scalar_lea.vmem %s231_s2, 16  ;;  %s295_s24 = scalar_lea.vmem %s231_s2, 32 }
  0x1f   :  { %v55_v7 = vrot.slane %v354_v6, %v54_v4  ;;  %v131_v33 = vunpack.c.0.s8 %v130_v21  ;;  %v199_v38 = vcombine.high %v195_v28, %v195_v28  ;;  %p292_p10 = scmp.ne.s32.totalorder %s231_s2, %s291_s23  ;;  %p296_p11 = scmp.lt.s32.totalorder %s231_s2, %s231_s2 }
  0x20   :  { %p297_p12 = scmp.lt.s32.totalorder %s295_s24, %s291_s23 }
  0x21   :  { %vm57_vm0 = vcmp.le.f32.partialorder %v349_v5, %v55_v7  ;;  %v98_v14 = vld [vmem:[#allocation2] sm:$0x1]  ;;  %v134_v43 = vsub.s32 %v131_v33, %v53_v3  ;;  %v105_v56 = vld [vmem:[#allocation3] sm:$0x1] }
  0x22   :  { %v58_v8 = vsel %vm57_vm0, 1, %v319_v1  ;;  %vm102_vm3 = vcmp.eq.s32.totalorder %v98_v14, 0  ;;  %v111_v49 = vld [vmem:[#allocation5] sm:$0x1]  ;;  %v108_v57 = vld [vmem:[#allocation4] sm:$0x1]  ;;  %p298_p13 = por %p297_p12, %p296_p11 }
  0x23   :  { %v59_v9 = vrot.slane %v58_v8, 4  ;;  %v114_v50 = vld [vmem:[#allocation6] sm:$0x1]  ;;  %v206_v51 = vrot.slane %v199_v38, %v134_v43 }
  0x24   :  { %p299_p0 = pnand %p298_p13, %p292_p10 }
  0x25   :  { %v60_v10 = vadd.s32 %v59_v9, %v58_v8  ;;  %v207_v63 = vcombine.high %v206_v51, %v206_v51  ;;  %v174_v8 = vcombine.high %v170_v2, %v170_v2 }
  0x27   :  { %v61_v11 = vrot.slane %v60_v10, 2  ;;  %v214_v4 = vrot.slane %v207_v63, %v134_v43 }
  0x29   :  { %v62_v12 = vadd.s32 %v61_v11, %v60_v10  ;;  %v215_v11 = vcombine.high %v214_v4, %v214_v4 }
  0x2b   :  { %v63_v13 = vrot.slane %v62_v12, 1 }
  0x2d   :  { %v64_v15 = vadd.s32 %v63_v13, %v62_v12  ;;  %v128_v13 = vcombine.high %v358_v16, %v358_v16 }
  0x2f   :  { %v117_v18 = vadd.s32 %v98_v14, %v64_v15  ;;  %v240_v19 = vadd.s32 4294967295, %v64_v15  ;;  %vm69_vm1 = vcmp.eq.s32.totalorder %v53_v3, %v64_v15  ;;  %vm103_vm4 = vcmp.lt.s32.totalorder %v64_v15, 8 }
  0x30   :  { %v84_v22 = vsel %vm69_vm1, %v358_v16, 0.0  ;;  %v91_v23 = vsel %vm69_vm1, %v349_v5, 0.0  ;;  %vm366_vm5 = vmand %vm102_vm3, %vm103_vm4  ;;  %vm99_vm6 = vcmp.gt.s32.totalorder %v64_v15, 0  ;;  %v181_v14 = vrot.slane %v174_v8, %v134_v43 }
  0x31   :  { %118 = vst [vmem:[#allocation2] sm:$0x1] %v117_v18  ;;  %vm68_vm2 = vcmp.eq.s32.totalorder %v53_v3, %v240_v19  ;;  %v85_v24 = vrot.slane %v84_v22, 4  ;;  %v92_v25 = vrot.slane %v91_v23, 4  ;;  %v149_v3 = vcombine.high %v349_v5, %v349_v5 }
  0x32   :  { %v70_v26 = vsel %vm68_vm2, %v358_v16, 0.0  ;;  %v77_v27 = vsel %vm68_vm2, %v349_v5, 0.0  ;;  %v135_v19 = vrot.slane %v128_v13, %v134_v43  ;;  %v182_v20 = vcombine.high %v181_v14, %v181_v14 }
  0x33   :  { %v71_v29 = vrot.slane %v70_v26, 4  ;;  %v78_v30 = vrot.slane %v77_v27, 4  ;;  %v86_v31 = vadd.f32 %v85_v24, %v84_v22  ;;  %v93_v32 = vadd.f32 %v92_v25, %v91_v23 }
  0x34   :  { %v156_v10 = vrot.slane %v149_v3, %v134_v43  ;;  %v136_v22 = vcombine.high %v135_v19, %v135_v19  ;;  %v189_v23 = vrot.slane %v182_v20, %v134_v43 }
  0x35   :  { %v72_v34 = vadd.f32 %v71_v29, %v70_v26  ;;  %v79_v35 = vadd.f32 %v78_v30, %v77_v27  ;;  %v87_v36 = vrot.slane %v86_v31, 2  ;;  %v94_v37 = vrot.slane %v93_v32, 2 }
  0x36   :  { %v157_v18 = vcombine.high %v156_v10, %v156_v10  ;;  %v143_v16 = vrot.slane %v136_v22, %v134_v43  ;;  %v190_v28 = vcombine.high %v189_v23, %v189_v23 }
  0x37   :  { %v73_v39 = vrot.slane %v72_v34, 2  ;;  %v80_v40 = vrot.slane %v79_v35, 2  ;;  %v88_v41 = vadd.f32 %v87_v36, %v86_v31  ;;  %v95_v42 = vadd.f32 %v94_v37, %v93_v32 }
  0x38   :  { %v122_v7 = vld [vmem:[#allocation2] sm:$0x1]  ;;  %v164_v21 = vrot.slane %v157_v18, %v134_v43  ;;  %v144_v31 = vcombine.high %v143_v16, %v143_v16 }
  0x39   :  { %v74_v44 = vadd.f32 %v73_v39, %v72_v34  ;;  %v81_v45 = vadd.f32 %v80_v40, %v79_v35  ;;  %v89_v46 = vrot.slane %v88_v41, 1  ;;  %v96_v47 = vrot.slane %v95_v42, 1 }
  0x3a   :  { %vm123_vm7 = vcmp.eq.s32.totalorder %v122_v7, 0  ;;  %vm124_vm8 = vcmp.eq.s32.totalorder %v122_v7, 8  ;;  %v165_v26 = vcombine.high %v164_v21, %v164_v21 }
  0x3b   :  { %v75_v52 = vrot.slane %v74_v44, 1  ;;  %v82_v53 = vrot.slane %v81_v45, 1  ;;  %v90_v54 = vadd.f32 %v89_v46, %v88_v41  ;;  %v97_v55 = vadd.f32 %v96_v47, %v95_v42  ;;  %vm380_vm9 = vmor %vm123_vm7, %vm124_vm8 }
  0x3d   :  { %v76_v59 = vadd.f32 %v75_v52, %v74_v44  ;;  %v83_v60 = vadd.f32 %v82_v53, %v81_v45  ;;  %v112_v61 = vsel %vm366_vm5, %v90_v54, %v111_v49  ;;  %v115_v62 = vsel %vm366_vm5, %v97_v55, %v114_v50 }
  0x3e   :  { %113 = vst [vmem:[#allocation5] sm:$0x1] %v112_v61  ;;  %116 = vst [vmem:[#allocation6] sm:$0x1] %v115_v62 }
  0x3f   :  { %v106_v0 = vsel %vm99_vm6, %v76_v59, %v105_v56  ;;  %v109_v1 = vsel %vm99_vm6, %v83_v60, %v108_v57 }
  0x40   :  { %107 = vst [vmem:[#allocation3] sm:$0x1] %v106_v0  ;;  %110 = vst [vmem:[#allocation4] sm:$0x1] %v109_v1 }
  0x45   :  { %v196_v9 = vld [vmem:[#allocation6] sm:$0x1]  ;;  %v171_v25 = vld [vmem:[#allocation5] sm:$0x1] }
  0x47   :  { %v147_v12 = vld [vmem:[#allocation4] sm:$0x1]  ;;  %v126_v24 = vld [vmem:[#allocation3] sm:$0x1] }
  0x48   :  { %v197_v15 = vsub.f32 %v196_v9, %v147_v12  ;;  %v172_v27 = vsub.f32 %v171_v25, %v126_v24  ;;  %v167_v29 = vsel %vm380_vm9, %v165_v26, %v147_v12  ;;  %v146_v36 = vsel %vm380_vm9, %v144_v31, %v126_v24 }
  0x49   :  { %v220_v34 = vsub.f32 %v354_v6, %v167_v29 }
  0x4a   :  { %v217_v5 = vsel %vm380_vm9, %v215_v11, %v197_v15  ;;  %v192_v32 = vsel %vm380_vm9, %v190_v28, %v172_v27 }
  0x4b   :  { %249 = vrcp.f32 %v217_v5 }
  0x58   :  { %v250_v30 = vpop.eup %249 }
  0x59   :  { %v219_v33 = vmul.f32 %v250_v30, %v192_v32 }
  0x5b   :  { %v221_v35 = vmul.f32 %v220_v34, %v219_v33 }
  0x5d   :  { %v222_v37 = vadd.f32 %v221_v35, %v146_v36 }
  0x5f   :  { %223 = vst [vmem:[#allocation12] sm:$0x1] %v222_v37 }
  0x60   :  { %302 = shalt.err (!%p299_p0)
}
  0x61   :  { %233 = dma.vmem_to_hbm [thread:$0]  %s231_s2, 16, %s399_s3, [#allocation9]  }
  0x62   :  { %315 = dma.done.wait [#allocation9], 16  }
  0x63   :  { %316 = vsyncadd [#allocation9], 4294967280 }
  0x64   :  { %237 = vsyncpa [#allocation8], 1 }
  0x65   :  { %238 = vsyncpa [#allocation11], 1 }
  0x66   :  { %239 = vsyncpa [#allocation9], 1 }

</bundles_post_ra>
